<compile_context>
chip_gen: v7x
topology: tpu7x:2x2x1
jax: 0.10.0
libtpu: 0.0.40
codegen_flags: <defaults>
</compile_context>

<pallas_src>
import functools

import jax
import jax.numpy as jnp
from jax.experimental import pallas as pl
from jax.experimental.pallas import tpu as pltpu

LANE = 128      # vreg lane width -> padded feature dimension of every layer
SUBLANE = 8     # sublane granularity -> batch-tile granularity


def _round_up(x, m):
    return (x + m - 1) // m * m


def _act_compute_dtype():
    """bf16 bias+tanh on v6e/v7x (bf16 VPU/EUP); f32 on v5e and older."""
    try:
        kind = jax.devices()[0].device_kind.lower()
    except Exception:
        return jnp.float32
    if any(old in kind for old in ("v2", "v3", "v4", "v5")):
        return jnp.float32
    return jnp.bfloat16


def _choose_batch_tile(batch, max_tile=2048):
    """Batch tile: >=2 even grid steps (v7x has 2 TCs), <= max_tile rows/step."""
    bp = _round_up(batch, SUBLANE)
    if bp <= SUBLANE:                       # tiny acting-path batch: single step
        return bp
    n_tiles = max(2, pl.cdiv(bp, max_tile))
    if n_tiles % 2:
        n_tiles += 1
    return _round_up(pl.cdiv(bp, n_tiles), SUBLANE)


def dqn_mlp_kernel(x_ref, w_ref, b_ref, o_ref, *, n_layers, n_state_p, act_dtype):
    """Whole 5-layer MLP for one (TB, Sp) activation tile of one network.

    x_ref : (TB, Sp)         f32  input rows (cast to bf16 in-kernel)
    w_ref : (L, LANE, LANE)  bf16 zero-padded weight slab (VMEM resident)
    b_ref : (L, 1, LANE)     f32  zero-padded bias slab   (VMEM resident)
    o_ref : (TB, LANE)       bf16 lane-dense output tile
    """
    h = x_ref[...].astype(jnp.bfloat16)                       # (TB, Sp)
    for l in range(n_layers):                                 # statically unrolled
        w = w_ref[0, :n_state_p, :] if l == 0 else w_ref[l]   # (Kin, LANE) bf16
        acc = jnp.dot(h, w, preferred_element_type=jnp.float32)
        # Bias-add in f32, tanh in the per-generation compute dtype
        # (bf16 EUP on v6e/v7x; f32 path kept for v5e).
        act = jnp.tanh((acc + b_ref[l]).astype(act_dtype))
        h = act.astype(jnp.bfloat16)                          # no-op when already bf16
    o_ref[...] = h                                            # bf16 lane-dense store


def pack_params(params):
    """Pack list of (W(in,out), b(1,out)) into zero-padded bf16/f32 slabs."""
    n_layers = len(params)
    w_slab = jnp.zeros((n_layers, LANE, LANE), jnp.bfloat16)
    b_slab = jnp.zeros((n_layers, 1, LANE), jnp.float32)
    for l, (w, b) in enumerate(params):
        fan_in, fan_out = w.shape
        w_slab = w_slab.at[l, :fan_in, :fan_out].set(w.astype(jnp.bfloat16))
        b_slab = b_slab.at[l, :, :fan_out].set(b.reshape(1, fan_out).astype(jnp.float32))
    return w_slab, b_slab


def _dqn_forward_stacked(x, w_slab, b_slab, n_state, n_action, *, max_tile_batch=2048):
    """Forward for N stacked networks in ONE pallas_call.

    x: (N, B, n_state) f32 ; w_slab: (N, L, LANE, LANE) bf16 ; b_slab: (N, L, 1, LANE) f32.
    Returns (N, B, n_action) f32 Q-values.
    """
    n_nets, batch, _ = x.shape
    n_layers = w_slab.shape[1]

    sp = _round_up(n_state, SUBLANE)            # sublane-aligned layer-0 fan-in
    if x.shape[-1] != sp:                       # no-op when n_state % 8 == 0
        x = jnp.pad(x, ((0, 0), (0, 0), (0, sp - x.shape[-1])))

    tb = _choose_batch_tile(batch, max_tile_batch)
    n_tiles = pl.cdiv(batch, tb)
    act_dtype = _act_compute_dtype()

    # Advisory cost estimate from the padded shapes the kernel actually executes.
    rows = n_tiles * tb
    flops = 2 * n_nets * rows * (sp * LANE + (n_layers - 1) * LANE * LANE)
    transcendentals = n_nets * rows * n_layers * LANE
    bytes_accessed = (x.size * x.dtype.itemsize + w_slab.size * 2
                      + b_slab.size * 4 + n_nets * rows * LANE * 2)

    out = pl.pallas_call(
        functools.partial(dqn_mlp_kernel, n_layers=n_layers, n_state_p=sp,
                          act_dtype=act_dtype),
        out_shape=jax.ShapeDtypeStruct((n_nets, batch, LANE), jnp.bfloat16),
        grid=(n_nets, n_tiles),
        in_specs=[
            # activation tile marches over the batch axis (net axis squeezed)
            pl.BlockSpec((None, tb, sp), lambda n, i: (n, i, 0)),
            # weight / bias slabs: constant along the batch axis -> VMEM resident,
            # re-DMA'd only when the (outer) net index changes.
            pl.BlockSpec((None, n_layers, LANE, LANE), lambda n, i: (n, 0, 0, 0)),
            pl.BlockSpec((None, n_layers, 1, LANE), lambda n, i: (n, 0, 0, 0)),
        ],
        out_specs=pl.BlockSpec((None, tb, LANE), lambda n, i: (n, i, 0)),
        compiler_params=pltpu.CompilerParams(
            # Both axes independent; "parallel" lets the grid shard across the two
            # v7x TensorCores (no-op on single-TC v5e/v6e).
            dimension_semantics=("parallel", "parallel")),
        cost_estimate=pl.CostEstimate(flops=flops, transcendentals=transcendentals,
                                      bytes_accessed=bytes_accessed),
    )(x, w_slab, b_slab)

    return out[..., :n_action].astype(jnp.float32)


def dqn_forward(x, w_slab, b_slab, n_state, n_action, *, max_tile_batch=2048):
    """Single-network forward: x (B, n_state) f32 -> (B, n_action) f32."""
    out = _dqn_forward_stacked(x[None], w_slab[None], b_slab[None],
                               n_state, n_action, max_tile_batch=max_tile_batch)
    return out[0]


def dqn_double_forward(x_online, x_target, w_slabs, b_slabs, n_state, n_action,
                       *, max_tile_batch=2048):
    """Fused online(s) + target(s') forwards for the learner step in ONE pallas_call.

    w_slabs: (2, L, LANE, LANE) bf16 ; b_slabs: (2, L, 1, LANE) f32.
    Returns (q_online, q_target), each (B, n_action) f32.
    """
    x = jnp.stack([x_online, x_target])
    out = _dqn_forward_stacked(x, w_slabs, b_slabs, n_state, n_action,
                               max_tile_batch=max_tile_batch)
    return out[0], out[1]


def init_params(key, n_state, n_hidden, n_action):
    """Deterministic init mimicking torch.nn.Linear's U(-1/sqrt(in), 1/sqrt(in))."""
    sizes = [(n_state, n_hidden),
             (n_hidden, n_hidden),
             (n_hidden, n_hidden),
             (n_hidden, n_hidden),
             (n_hidden, n_action)]
    params = []
    for fan_in, fan_out in sizes:
        key, kw, kb = jax.random.split(key, 3)
        bound = 1.0 / jnp.sqrt(jnp.float32(fan_in))
        w = jax.random.uniform(kw, (fan_in, fan_out), jnp.float32, -bound, bound)
        b = jax.random.uniform(kb, (1, fan_out), jnp.float32, -bound, bound)
        params.append((w, b))
    return params


def reference_forward(x, params):
    h = x
    for w, b in params:
        h = jnp.tanh(h @ w + b)
    return h


if __name__ == "__main__":
    # dims = (n_state, n_action) as in DQN_learner.__init__ ; n_hidden = 2*n_state
    n_state, n_action = 32, 8
    n_hidden = 2 * n_state

    key = jax.random.PRNGKey(0)
    key, k_online, k_target, kx, kxp = jax.random.split(key, 5)
    online_params = init_params(k_online, n_state, n_hidden, n_action)
    target_params = init_params(k_target, n_state, n_hidden, n_action)
    w_on, b_on = pack_params(online_params)
    w_tg, b_tg = pack_params(target_params)

    # 1) Replay-batch forward: 2 even grid steps, weight slab resident across both.
    batch = 64
    x = jax.random.normal(kx, (batch, n_state), jnp.float32)
    out = jax.block_until_ready(dqn_forward(x, w_on, b_on, n_state, n_action))
    ref = reference_forward(x, online_params)
    assert out.shape == (batch, n_action)
    assert jnp.allclose(out, ref, atol=5e-2, rtol=5e-2), \
        float(jnp.max(jnp.abs(out - ref)))

    # 2) Acting-path forward: tiny ragged batch, single grid step, no wrapper pad.
    x_small = x[:2]
    out_small = jax.block_until_ready(
        dqn_forward(x_small, w_on, b_on, n_state, n_action))
    assert out_small.shape == (2, n_action)
    assert jnp.allclose(out_small, reference_forward(x_small, online_params),
                        atol=5e-2, rtol=5e-2)

    # 3) Fused online + target forwards (learner step) in one pallas_call.
    x_next = jax.random.normal(kxp, (batch, n_state), jnp.float32)
    w2 = jnp.stack([w_on, w_tg])
    b2 = jnp.stack([b_on, b_tg])
    q_s, q_sp = dqn_double_forward(x, x_next, w2, b2, n_state, n_action)
    jax.block_until_ready((q_s, q_sp))
    assert jnp.allclose(q_s, reference_forward(x, online_params),
                        atol=5e-2, rtol=5e-2)
    assert jnp.allclose(q_sp, reference_forward(x_next, target_params),
                        atol=5e-2, rtol=5e-2)

    # TODO(synk): best_action / eps_greedy_action / learn (SmoothL1 loss, optimizer,
    # grad clamping) are host-side RL control flow, not kernel work; only forward()
    # (single and fused online+target) is implemented as a Pallas kernel.
    print("KERNEL_OK")
</pallas_src>

<mosaic_0001>
module attributes {stable_mosaic.version = 11 : i64} {
  func.func @dqn_mlp_kernel(%arg0: i32, %arg1: i32, %arg2: memref<1x32x32xf32, #tpu.memory_space<vmem>>, %arg3: memref<1x5x128x128xbf16, #tpu.memory_space<vmem>>, %arg4: memref<1x5x1x128xf32, #tpu.memory_space<vmem>>, %arg5: memref<1x32x128xbf16, #tpu.memory_space<vmem>>) attributes {dimension_semantics = [#tpu.dimension_semantics<parallel>, #tpu.dimension_semantics<parallel>], iteration_bounds = array<i64: 1, 2>, scalar_prefetch = 0 : i64, scratch_operands = 0 : i64, tpu.core_type = #tpu.core_type<tc>, window_params = [{transform_indices = @transform_0, window_bounds = array<i64: 1, 32, 32>}, {transform_indices = @transform_1, window_bounds = array<i64: 1, 5, 128, 128>}, {transform_indices = @transform_2, window_bounds = array<i64: 1, 5, 1, 128>}, {transform_indices = @transform_3, window_bounds = array<i64: 1, 32, 128>}]} {
    %c0 = arith.constant 0 : index
    %c0_0 = arith.constant 0 : index
    %c0_1 = arith.constant 0 : index
    %0 = vector.load %arg2[%c0, %c0_0, %c0_1] : memref<1x32x32xf32, #tpu.memory_space<vmem>>, vector<1x32x32xf32>
    %1 = vector.shape_cast %0 : vector<1x32x32xf32> to vector<32x32xf32>
    %2 = arith.truncf %1 : vector<32x32xf32> to vector<32x32xbf16>
    %c0_2 = arith.constant 0 : index
    %c0_3 = arith.constant 0 : index
    %c0_4 = arith.constant 0 : index
    %c0_5 = arith.constant 0 : index
    %3 = vector.load %arg3[%c0_2, %c0_3, %c0_4, %c0_5] : memref<1x5x128x128xbf16, #tpu.memory_space<vmem>>, vector<1x1x32x128xbf16>
    %4 = vector.shape_cast %3 : vector<1x1x32x128xbf16> to vector<32x128xbf16>
    %cst = arith.constant dense<0.000000e+00> : vector<32x128xf32>
    %5 = tpu.matmul %2, %4, %cst {dimension_numbers = #tpu.dot_dimension_numbers<[1], [0], [0], [1], [0, 0, 1, 1], [], []>} : vector<32x32xbf16>, vector<32x128xbf16>, vector<32x128xf32> -> vector<32x128xf32>
    %c0_6 = arith.constant 0 : index
    %c0_7 = arith.constant 0 : index
    %c0_8 = arith.constant 0 : index
    %c0_9 = arith.constant 0 : index
    %6 = vector.load %arg4[%c0_6, %c0_7, %c0_8, %c0_9] : memref<1x5x1x128xf32, #tpu.memory_space<vmem>>, vector<1x1x1x128xf32>
    %7 = vector.shape_cast %6 : vector<1x1x1x128xf32> to vector<1x128xf32>
    %8 = vector.broadcast %7 : vector<1x128xf32> to vector<32x128xf32>
    %9 = arith.addf %5, %8 : vector<32x128xf32>
    %10 = arith.truncf %9 : vector<32x128xf32> to vector<32x128xbf16>
    %11 = math.tanh %10 : vector<32x128xbf16>
    %c0_10 = arith.constant 0 : index
    %c1 = arith.constant 1 : index
    %c0_11 = arith.constant 0 : index
    %c0_12 = arith.constant 0 : index
    %12 = vector.load %arg3[%c0_10, %c1, %c0_11, %c0_12] : memref<1x5x128x128xbf16, #tpu.memory_space<vmem>>, vector<1x1x128x128xbf16>
    %13 = vector.shape_cast %12 : vector<1x1x128x128xbf16> to vector<128x128xbf16>
    %cst_13 = arith.constant dense<0.000000e+00> : vector<32x128xf32>
    %14 = tpu.matmul %11, %13, %cst_13 {dimension_numbers = #tpu.dot_dimension_numbers<[1], [0], [0], [1], [0, 0, 1, 1], [], []>} : vector<32x128xbf16>, vector<128x128xbf16>, vector<32x128xf32> -> vector<32x128xf32>
    %c0_14 = arith.constant 0 : index
    %c1_15 = arith.constant 1 : index
    %c0_16 = arith.constant 0 : index
    %c0_17 = arith.constant 0 : index
    %15 = vector.load %arg4[%c0_14, %c1_15, %c0_16, %c0_17] : memref<1x5x1x128xf32, #tpu.memory_space<vmem>>, vector<1x1x1x128xf32>
    %16 = vector.shape_cast %15 : vector<1x1x1x128xf32> to vector<1x128xf32>
    %17 = vector.broadcast %16 : vector<1x128xf32> to vector<32x128xf32>
    %18 = arith.addf %14, %17 : vector<32x128xf32>
    %19 = arith.truncf %18 : vector<32x128xf32> to vector<32x128xbf16>
    %20 = math.tanh %19 : vector<32x128xbf16>
    %c0_18 = arith.constant 0 : index
    %c2 = arith.constant 2 : index
    %c0_19 = arith.constant 0 : index
    %c0_20 = arith.constant 0 : index
    %21 = vector.load %arg3[%c0_18, %c2, %c0_19, %c0_20] : memref<1x5x128x128xbf16, #tpu.memory_space<vmem>>, vector<1x1x128x128xbf16>
    %22 = vector.shape_cast %21 : vector<1x1x128x128xbf16> to vector<128x128xbf16>
    %cst_21 = arith.constant dense<0.000000e+00> : vector<32x128xf32>
    %23 = tpu.matmul %20, %22, %cst_21 {dimension_numbers = #tpu.dot_dimension_numbers<[1], [0], [0], [1], [0, 0, 1, 1], [], []>} : vector<32x128xbf16>, vector<128x128xbf16>, vector<32x128xf32> -> vector<32x128xf32>
    %c0_22 = arith.constant 0 : index
    %c2_23 = arith.constant 2 : index
    %c0_24 = arith.constant 0 : index
    %c0_25 = arith.constant 0 : index
    %24 = vector.load %arg4[%c0_22, %c2_23, %c0_24, %c0_25] : memref<1x5x1x128xf32, #tpu.memory_space<vmem>>, vector<1x1x1x128xf32>
    %25 = vector.shape_cast %24 : vector<1x1x1x128xf32> to vector<1x128xf32>
    %26 = vector.broadcast %25 : vector<1x128xf32> to vector<32x128xf32>
    %27 = arith.addf %23, %26 : vector<32x128xf32>
    %28 = arith.truncf %27 : vector<32x128xf32> to vector<32x128xbf16>
    %29 = math.tanh %28 : vector<32x128xbf16>
    %c0_26 = arith.constant 0 : index
    %c3 = arith.constant 3 : index
    %c0_27 = arith.constant 0 : index
    %c0_28 = arith.constant 0 : index
    %30 = vector.load %arg3[%c0_26, %c3, %c0_27, %c0_28] : memref<1x5x128x128xbf16, #tpu.memory_space<vmem>>, vector<1x1x128x128xbf16>
    %31 = vector.shape_cast %30 : vector<1x1x128x128xbf16> to vector<128x128xbf16>
    %cst_29 = arith.constant dense<0.000000e+00> : vector<32x128xf32>
    %32 = tpu.matmul %29, %31, %cst_29 {dimension_numbers = #tpu.dot_dimension_numbers<[1], [0], [0], [1], [0, 0, 1, 1], [], []>} : vector<32x128xbf16>, vector<128x128xbf16>, vector<32x128xf32> -> vector<32x128xf32>
    %c0_30 = arith.constant 0 : index
    %c3_31 = arith.constant 3 : index
    %c0_32 = arith.constant 0 : index
    %c0_33 = arith.constant 0 : index
    %33 = vector.load %arg4[%c0_30, %c3_31, %c0_32, %c0_33] : memref<1x5x1x128xf32, #tpu.memory_space<vmem>>, vector<1x1x1x128xf32>
    %34 = vector.shape_cast %33 : vector<1x1x1x128xf32> to vector<1x128xf32>
    %35 = vector.broadcast %34 : vector<1x128xf32> to vector<32x128xf32>
    %36 = arith.addf %32, %35 : vector<32x128xf32>
    %37 = arith.truncf %36 : vector<32x128xf32> to vector<32x128xbf16>
    %38 = math.tanh %37 : vector<32x128xbf16>
    %c0_34 = arith.constant 0 : index
    %c4 = arith.constant 4 : index
    %c0_35 = arith.constant 0 : index
    %c0_36 = arith.constant 0 : index
    %39 = vector.load %arg3[%c0_34, %c4, %c0_35, %c0_36] : memref<1x5x128x128xbf16, #tpu.memory_space<vmem>>, vector<1x1x128x128xbf16>
    %40 = vector.shape_cast %39 : vector<1x1x128x128xbf16> to vector<128x128xbf16>
    %cst_37 = arith.constant dense<0.000000e+00> : vector<32x128xf32>
    %41 = tpu.matmul %38, %40, %cst_37 {dimension_numbers = #tpu.dot_dimension_numbers<[1], [0], [0], [1], [0, 0, 1, 1], [], []>} : vector<32x128xbf16>, vector<128x128xbf16>, vector<32x128xf32> -> vector<32x128xf32>
    %c0_38 = arith.constant 0 : index
    %c4_39 = arith.constant 4 : index
    %c0_40 = arith.constant 0 : index
    %c0_41 = arith.constant 0 : index
    %42 = vector.load %arg4[%c0_38, %c4_39, %c0_40, %c0_41] : memref<1x5x1x128xf32, #tpu.memory_space<vmem>>, vector<1x1x1x128xf32>
    %43 = vector.shape_cast %42 : vector<1x1x1x128xf32> to vector<1x128xf32>
    %44 = vector.broadcast %43 : vector<1x128xf32> to vector<32x128xf32>
    %45 = arith.addf %41, %44 : vector<32x128xf32>
    %46 = arith.truncf %45 : vector<32x128xf32> to vector<32x128xbf16>
    %47 = math.tanh %46 : vector<32x128xbf16>
    %c0_42 = arith.constant 0 : index
    %c0_43 = arith.constant 0 : index
    %c0_44 = arith.constant 0 : index
    %48 = vector.load %arg5[%c0_42, %c0_43, %c0_44] : memref<1x32x128xbf16, #tpu.memory_space<vmem>>, vector<1x32x128xbf16>
    %49 = vector.shape_cast %48 : vector<1x32x128xbf16> to vector<32x128xbf16>
    %50 = vector.shape_cast %47 : vector<32x128xbf16> to vector<1x32x128xbf16>
    tpu.vector_store %arg5[%c0_42, %c0_43, %c0_44], %50 {strides = array<i32>} : memref<1x32x128xbf16, #tpu.memory_space<vmem>>, vector<1x32x128xbf16>,
    return
  }
  func.func @transform_0(%arg0: i32, %arg1: i32) -> (i32, i32, i32) {
    %c0_i32 = arith.constant 0 : i32
    %c0_i32_0 = arith.constant 0 : i32
    return %arg0, %arg1, %c0_i32 : i32, i32, i32
  }
  func.func @transform_1(%arg0: i32, %arg1: i32) -> (i32, i32, i32, i32) {
    %c0_i32 = arith.constant 0 : i32
    %c0_i32_0 = arith.constant 0 : i32
    %c0_i32_1 = arith.constant 0 : i32
    %c0_i32_2 = arith.constant 0 : i32
    return %arg0, %c0_i32, %c0_i32_0, %c0_i32_1 : i32, i32, i32, i32
  }
  func.func @transform_2(%arg0: i32, %arg1: i32) -> (i32, i32, i32, i32) {
    %c0_i32 = arith.constant 0 : i32
    %c0_i32_0 = arith.constant 0 : i32
    %c0_i32_1 = arith.constant 0 : i32
    %c0_i32_2 = arith.constant 0 : i32
    return %arg0, %c0_i32, %c0_i32_0, %c0_i32_1 : i32, i32, i32, i32
  }
  func.func @transform_3(%arg0: i32, %arg1: i32) -> (i32, i32, i32) {
    %c0_i32 = arith.constant 0 : i32
    %c0_i32_0 = arith.constant 0 : i32
    return %arg0, %arg1, %c0_i32 : i32, i32, i32
  }
}

</mosaic_0001>

<bundles_post_ra>
// kernel: tpu_custom_call.1
= control target key start
LH: loop header
LB: loop body
LE: loop exit
PB: predicated region body
PF: predicated region fallthrough
CT: control target
= control target key end

     0   :  { %8 = vsyncpa [#allocation3], 0  ;;  %s1603_s0 = inlined_call_operand.vmem [shape: f32[1,64,32], index: 0, kind: input, shape index: {}]   ;;  %s1604_s1 = inlined_call_operand.hbm [shape: bf16[1,5,128,128], index: 1, kind: input, shape index: {}]   ;;  %s1605_s2 = inlined_call_operand.vmem [shape: f32[1,5,1,128], index: 2, kind: input, shape index: {}]   ;;  %s1606_s3 = inlined_call_operand.hbm [shape: bf16[1,64,128], index: 3, kind: output, shape index: {}]  }
   0x1   :  { %9 = vsyncpa [#allocation4], 0 }
   0x2   :  { %11 = vsyncpa [#allocation4 + $0x1], 0  ;;  %s1436_s12 = smov 0   ;;  %s1438_s13 = smov 0  }
   0x3   :  { %s1440_s14 = smov 0   ;;  %s1442_s15 = smov 0  }
   0x4   :  { %s1444_s16 = smov 0   ;;  %s1446_s17 = smov 0  }
   0x5 LB: > { %s976_s18 = sadd.s32 4294967295, %s1408_s17   ;;  %s977_s19 = sadd.s32 4294967294, %s1408_s17   ;;  %s1408_s17 = sphi %s1446_s17, %s17_s17   ;;  %s1404_s16 = sphi %s1444_s16, %s1624_s16   ;;  %s1400_s15 = sphi %s1442_s15, %s1623_s15   ;;  %s1396_s14 = sphi %s1440_s14, %s1622_s14   ;;  %s1392_s13 = sphi %s1438_s13, %s1621_s13   ;;  %s1388_s12 = sphi %s1436_s12, %s1620_s12  }
   0x6   : > { %s26_s20 = sadd.s32 1, %s1404_s16  ;;  %s118_s21 = sadd.s32 1, %s1396_s14 }
   0x7   : > { %p27_p0 = scmp.ge.s32.totalorder %s26_s20, 2  ;;  %p128_p1 = scmp.ne.s32.totalorder %s1396_s14, %s1392_s13 }
   0x8   : > { %p129_p2 = scmp.eq.s32.totalorder %s976_s18, 1  ;;  %p134_p3 = scmp.ne.s32.totalorder %s1392_s13, %s1388_s12 }
   0x9   : > { %s1626_s20 = smov (%p27_p0, %s26_s20), 0  ;;  %p135_p5 = scmp.eq.s32.totalorder %s977_s19, 1 }
   0xa   : > { %p1476_p4 = por %p129_p2, %p128_p1  ;;  %s114_s23 = ssub.s32 %s1404_s16, %s1626_s20 }
   0xb   : > { %p978_p6 = scmp.ge.s32.totalorder %s1408_s17, 1  ;;  %p116_p7 = scmp.eq.s32.totalorder %s114_s23, 0 }
   0xc   : > { %s1611_s22 = scalar_select %p1476_p4, 1, 0 }
   0xd   : > { %p1483_p8 = por %p135_p5, %p134_p3  ;;  %p142_p9 = scmp.lt.s32.totalorder %s1408_s17, 3 }
   0xe   : > { %s1489_s25 = scalar_select %p116_p7, %s1396_s14, %s118_s21  }
   0xf   : > { %s1612_s24 = scalar_select %p1483_p8, 1, 0 }
  0x10   : > { %p1491_p10 = pnand %p978_p6, %p142_p9  ;;  %p1495_p11 = scmp.eq.s32.totalorder %s976_s18, 0 }
  0x11   : > { %s1410_s28 = smov [#allocation2]   ;;  %s1298_s6 = scalar_lea.hbm %s1604_s1, 5120 }
  0x12   : > { %s1613_s26 = scalar_select %p1491_p10, 1, 0 }
  0x13   : > { %s1614_s27 = scalar_select %p1495_p11, 1, 0 }
  0x14   : > { %p1180_p12 = pneg %p1491_p10  ;;  %s157_s29 = sshll.u32 %s1410_s28, 4  ;;  %s158_s29 = int_to_ptr.vmem [resolvable:$true] %s157_s29 }
  0x15   : > { %p1299_p0 = scmp.ne.s32.totalorder %s1604_s1, %s1298_s6  ;;  %p1305_p5 = scmp.lt.u32.totalorder %s1298_s6, %s1604_s1 }
  0x16   : > { %p1503_p13 = pnand %p1495_p11, %p1180_p12 }
  0x18   : > { %p1300_p1 = pneg %p1503_p13 }
  0x1a   : > { %p1301_p2 = pnand %p1300_p1, %p1299_p0 }
  0x1c   : > { %p1302_p3 = pneg %p1301_p2 }
  0x1e   : > { %p1307_p6 = pnand %p1305_p5, %p1302_p3 }
  0x20   : > { %1310 = shalt.err (!%p1307_p6)
}
  0x21   : > { %s1311_s11 = scalar_lea.vmem %s158_s29, 5120  ;;  %p1319_p8 = scmp.lt.s32.totalorder %s158_s29, %s158_s29 }
  0x22   : > { %p1312_p7 = scmp.ne.s32.totalorder %s158_s29, %s1311_s11  ;;  %p1320_p4 = scmp.lt.s32.totalorder %s1311_s11, %s1311_s11 }
  0x24   : > { %p1314_p9 = pnand %p1312_p7, %p1300_p1  ;;  %p1321_p11 = por %p1320_p4, %p1319_p8 }
  0x26   : > { %p1315_p12 = pneg %p1314_p9 }
  0x28   : > { %p1322_p10 = pnand %p1321_p11, %p1315_p12 }
  0x2a   : > { %1325 = shalt.err (!%p1322_p10)
}
  0x2b   : > { %s1411_s18 = smov 64   ;;  %s1412_s19 = smov 4  }
  0x2c   : > { %1183 = dma.hbm_to_vmem [thread:$0]  (!%p1503_p13), %s1604_s1, 5120, %s158_s29, [#allocation3], %s1411_s18, %s1411_s18, %s1412_s19  }
  0x2d   : > { %p1616_p0 = scmp.ne.s32.totalorder %s1613_s26, 0 }
  0x2e   : > { %p1617_p2 = scmp.ne.s32.totalorder (!%p1616_p0), %s1614_s27, 0 }
  0x2f   : > { %193 = sbr.rel (%p1616_p0) target bundleno = 1241 (0x4d9), region = 32 }
  0x36   : > { %1379 = dma.done.wait (%p1617_p2), [#allocation3], 5120  }
  0x37   : > { %1381 = vsyncadd (%p1617_p2), [#allocation3], 4294962176  ;;  %s985_s28 = sshll.u32 %s1400_s15, 2  ;;  %v1244_v0 = vld [vmem:[#allocation2] sm:$0xff]   ;;  %v1245_v1 = vld [vmem:[#allocation2 + $0x8] sm:$0xff]   ;;  %vm270_vm0 = vcmask 261120  }
  0x38   : > { %p228_p4 = scmp.lt.s32.totalorder %s985_s28, 7  ;;  %1086 = vmatprep.subr.bf16.mxu0 %v1244_v0  ;;  %v1246_v7 = vld [vmem:[#allocation2 + $0x40] sm:$0xff]   ;;  %v1247_v8 = vld [vmem:[#allocation2 + $0x48] sm:$0xff]   ;;  %v1248_v10 = vld [vmem:[#allocation2 + $0x50] sm:$0xff]   ;;  %s222_s21 = sand.u32 1, %s1392_s13  }
  0x39   : > { %1087 = vmatpush3.bf16.msra.mxu0 %v1244_v0  ;;  %1094 = vmatprep.subr.bf16.mxu1 %v1246_v7  ;;  %v1249_v11 = vld [vmem:[#allocation2 + $0x58] sm:$0xff]   ;;  %v1250_v12 = vld [vmem:[#allocation2 + $0x60] sm:$0xff]   ;;  %v1251_v13 = vld [vmem:[#allocation2 + $0x68] sm:$0xff]   ;;  %s984_s23 = sshll.u32 %s222_s21, 4  ;;  %p1618_p10 = scmp.ne.s32.totalorder %s1611_s22, 0 }
  0x3a   : > { %s1628_s28 = smov (!%p228_p4, %s985_s28), 7  ;;  %1088 = vmatprep.subr.bf16.mxu0 %v1245_v1  ;;  %1095 = vmatpush3.bf16.msra.mxu1 %v1246_v7  ;;  %v1252_v14 = vld [vmem:[#allocation2 + $0x70] sm:$0xff]   ;;  %v1253_v15 = vld [vmem:[#allocation2 + $0x78] sm:$0xff]   ;;  %v1254_v16 = vld [vmem:[#allocation2 + $0x80] sm:$0xff]   ;;  %s1413_s29 = smov [#allocation5]  }
  0x3b   : > { %s986_s4 = sshll.u32 %s1628_s28, 3  ;;  %1096 = vmatprep.subr.bf16.mxu1 %v1247_v8  ;;  %v1255_v17 = vld [vmem:[#allocation2 + $0x88] sm:$0xff]   ;;  %v1256_v18 = vld [vmem:[#allocation2 + $0x90] sm:$0xff]   ;;  %v987_v20 = vld [vmem:[%s1605_s2] ss:$0 sm:$0xff]  ;;  %s1041_s28 = sshll.u32 %s1400_s15, 8 }
  0x3c   : > { %s233_s6 = scalar_lea.vmem %s1603_s0, %s986_s4  ;;  %v1257_v32 = vld [vmem:[#allocation2 + $0x98] sm:$0xff]   ;;  %v1258_v33 = vld [vmem:[#allocation2 + $0xa0] sm:$0xff]   ;;  %v1259_v34 = vld [vmem:[#allocation2 + $0xa8] sm:$0xff]   ;;  %s224_s4 = scalar_lea.vmem [#allocation5], %s984_s23 }
  0x3d   : > { %v241_v2 = vld [vmem:[%s233_s6] sm:$0xff]  ;;  %v242_v3 = vld [vmem:[%s233_s6 + $0x8] sm:$0xff]  ;;  %v243_v4 = vld [vmem:[%s233_s6 + $0x10] sm:$0xff]  ;;  %1089 = vmatpush3.bf16.msra.mxu0 %v1245_v1  ;;  %s868_s5 = sshll.u32 %s224_s4, 4  ;;  %s1553_s26 = scalar_lea.hbm %s1606_s3, %s1041_s28  ;;  %s1555_s5 = int_to_ptr.vmem [resolvable:$true] %s868_s5 }
  0x3e   : > { %v245_v5 = vpack.c.bf16 %v242_v3, %v241_v2  ;;  %v244_v6 = vld [vmem:[%s233_s6 + $0x18] sm:$0xff]  ;;  %1097 = vmatpush3.bf16.msra.mxu1 %v1247_v8  ;;  %1114 = vmatprep.subr.bf16.mxu0 %v1254_v16  ;;  %v1260_v35 = vld [vmem:[#allocation2 + $0xb0] sm:$0xff]   ;;  %v1262_v37 = vld [vmem:[#allocation2 + $0xc0] sm:$0xff]   ;;  %s1557_s15 = scalar_lea.sflag [#allocation4], %s222_s21  ;;  %s1326_s27 = scalar_lea.vmem %s1555_s5, 256 }
  0x3f   : > { %v246_v9 = vpack.c.bf16 %v244_v6, %v243_v4  ;;  %1098 = vmatprep.subr.bf16.mxu1 %v1248_v10  ;;  %v1261_v36 = vld [vmem:[#allocation2 + $0xb8] sm:$0xff]   ;;  %v1263_v38 = vld [vmem:[#allocation2 + $0xc8] sm:$0xff]   ;;  %v1264_v39 = vld [vmem:[#allocation2 + $0xd0] sm:$0xff]   ;;  %p1327_p8 = scmp.ne.s32.totalorder %s1555_s5, %s1326_s27  ;;  %s1330_s7 = sshll.u32 %s1413_s29, 4  ;;  %s1331_s7 = int_to_ptr.vmem [resolvable:$false] %s1330_s7 }
  0x40   : > { %1090 = vmatprep.mubr.msk.bf16.mxu0 %vm270_vm0, %v245_v5  ;;  %v993_v41 = vld [vmem:[%s1605_s2 + $0x1] ss:$0 sm:$0xff]  ;;  %v1265_v53 = vld [vmem:[#allocation2 + $0xd8] sm:$0xff]   ;;  %v1267_v55 = vld [vmem:[#allocation2 + $0xe8] sm:$0xff]   ;;  %s1332_s8 = scalar_lea.vmem %s1331_s7, 512  ;;  %p1333_p1 = scmp.lt.s32.totalorder %s1555_s5, %s1331_s7 }
  0x41   : > { %1091 = vmatmul.mubr.msk.bf16.vlgmr.msra.gmra.mrb[0].mxu0 %vm270_vm0, %v246_v9  ;;  %v1266_v54 = vld [vmem:[#allocation2 + $0xe0] sm:$0xff]   ;;  %v1268_v56 = vld [vmem:[#allocation2 + $0xf0] sm:$0xff]   ;;  %v1269_v57 = vld [vmem:[#allocation2 + $0xf8] sm:$0xff]   ;;  %p1328_p11 = pnand %p1327_p8, %p1618_p10  ;;  %p1334_p3 = scmp.lt.s32.totalorder %s1332_s8, %s1326_s27 }
  0x42   : > { %1099 = vmatpush3.bf16.msra.mxu1 %v1248_v10  ;;  %1115 = vmatpush3.bf16.msra.mxu0 %v1254_v16  ;;  %v1270_v58 = vld [vmem:[#allocation2 + $0x100] sm:$0xff]   ;;  %v1271_v59 = vld [vmem:[#allocation2 + $0x108] sm:$0xff]   ;;  %v1272_v60 = vld [vmem:[#allocation2 + $0x110] sm:$0xff]  }
  0x43   : > { %1100 = vmatprep.subr.bf16.mxu1 %v1249_v11  ;;  %1116 = vmatprep.subr.bf16.mxu0 %v1255_v17  ;;  %v1003_v62 = vld [vmem:[%s1605_s2 + $0x2] ss:$0 sm:$0xff]  ;;  %v1273_v10 = vld [vmem:[#allocation2 + $0x118] sm:$0xff]   ;;  %v1013_v16 = vld [vmem:[%s1605_s2 + $0x3] ss:$0 sm:$0xff]  ;;  %p1329_p13 = pneg %p1328_p11  ;;  %p1335_p5 = por %p1334_p3, %p1333_p1 }
  0x45   : > { %p1336_p6 = pnand %p1335_p5, %p1329_p13 }
  0x46   : > { %1101 = vmatpush3.bf16.msra.mxu1 %v1249_v11  ;;  %1117 = vmatpush3.bf16.msra.mxu0 %v1255_v17  ;;  %v1274_v11 = vld [vmem:[#allocation2 + $0x120] sm:$0xff]  }
  0x47   : > { %1102 = vmatprep.subr.bf16.mxu1 %v1250_v12  ;;  %1118 = vmatprep.subr.bf16.mxu0 %v1256_v18 }
  0x4a   : > { %1103 = vmatpush3.bf16.msra.mxu1 %v1250_v12  ;;  %1119 = vmatpush3.bf16.msra.mxu0 %v1256_v18  ;;  %v1275_v12 = vld [vmem:[#allocation2 + $0x128] sm:$0xff]  }
  0x4b   : > { %1104 = vmatprep.subr.bf16.mxu1 %v1251_v13  ;;  %1120 = vmatprep.subr.bf16.mxu0 %v1257_v32 }
  0x4e   : > { %1105 = vmatpush3.bf16.msra.mxu1 %v1251_v13  ;;  %1121 = vmatpush3.bf16.msra.mxu0 %v1257_v32  ;;  %v1276_v13 = vld [vmem:[#allocation2 + $0x130] sm:$0xff]  }
  0x4f   : > { %1106 = vmatprep.subr.bf16.mxu1 %v1252_v14  ;;  %1122 = vmatprep.subr.bf16.mxu0 %v1258_v33 }
  0x52   : > { %1107 = vmatpush3.bf16.msra.mxu1 %v1252_v14  ;;  %1123 = vmatpush3.bf16.msra.mxu0 %v1258_v33  ;;  %v1277_v14 = vld [vmem:[#allocation2 + $0x138] sm:$0xff]  }
  0x53   : > { %1108 = vmatprep.subr.bf16.mxu1 %v1253_v15  ;;  %1124 = vmatprep.subr.bf16.mxu0 %v1259_v34 }
  0x56   : > { %1109 = vmatpush3.bf16.msra.mxu1 %v1253_v15  ;;  %1125 = vmatpush3.bf16.msra.mxu0 %v1259_v34 }
  0x57   : > { %1126 = vmatprep.subr.bf16.mxu0 %v1260_v35  ;;  %1134 = vmatprep.subr.bf16.mxu1 %v1262_v37 }
  0x5a   : > { %1127 = vmatpush3.bf16.msra.mxu0 %v1260_v35 }
  0x5b   : > { %1128 = vmatprep.subr.bf16.mxu0 %v1261_v36 }
  0x5e   : > { %1129 = vmatpush3.bf16.msra.mxu0 %v1261_v36 }
  0x5f   : > { %1154 = vmatprep.subr.bf16.mxu0 %v1270_v58 }
 0x114   : > { %v1092_v19 = vpop.f32.mrb[0].mxu0 }
 0x115   : > { %v311_v21 = vpop.f32.mrb[1].mxu0  ;;  %v320_v23 = vadd.f32 %v1092_v19, %v987_v20 }
 0x116   : > { %v1093_v22 = vpop.f32.mrb[2].mxu0  ;;  %v312_v26 = vadd.f32 %v987_v20, %v311_v21 }
 0x117   : > { %v323_v24 = vadd.f32 %v1093_v22, %v987_v20  ;;  %v314_v25 = vpop.f32.mrb[3].mxu0 }
 0x118   : > { %v315_v27 = vadd.f32 %v987_v20, %v314_v25 }
 0x119   : > { %v327_v28 = vpack.c.bf16 %v323_v24, %v320_v23 }
 0x11a   : > { %v326_v29 = vpack.c.bf16 %v315_v27, %v312_v26 }
 0x11c   : > { %1278 = vtanh.bf16 %v326_v29  ;;  %v1023_v29 = vld [vmem:[%s1605_s2 + $0x4] ss:$0 sm:$0xff] }
 0x11d   : > { %1280 = vtanh.bf16 %v327_v28 }
 0x127   : > { %v1279_v30 = vpop.eup %1278 }
 0x128   : > { %v1281_v31 = vpop.eup %1280  ;;  %1110 = vmatprep.mubr.bf16.mxu1 %v1279_v30 }
 0x129   : > { %1111 = vmatmul.mubr.bf16.vlgmr.msra.gmra.mrb[0].mxu1 %v1281_v31 }
 0x12a   : > { %1135 = vmatpush3.bf16.msra.mxu1 %v1262_v37 }
 0x12b   : > { %1136 = vmatprep.subr.bf16.mxu1 %v1263_v38 }
 0x12e   : > { %1137 = vmatpush3.bf16.msra.mxu1 %v1263_v38 }
 0x12f   : > { %1138 = vmatprep.subr.bf16.mxu1 %v1264_v39 }
 0x132   : > { %1139 = vmatpush3.bf16.msra.mxu1 %v1264_v39 }
 0x133   : > { %1140 = vmatprep.subr.bf16.mxu1 %v1265_v53 }
 0x136   : > { %1141 = vmatpush3.bf16.msra.mxu1 %v1265_v53 }
 0x137   : > { %1142 = vmatprep.subr.bf16.mxu1 %v1266_v54 }
 0x13a   : > { %1143 = vmatpush3.bf16.msra.mxu1 %v1266_v54 }
 0x13b   : > { %1144 = vmatprep.subr.bf16.mxu1 %v1267_v55 }
 0x13e   : > { %1145 = vmatpush3.bf16.msra.mxu1 %v1267_v55 }
 0x13f   : > { %1146 = vmatprep.subr.bf16.mxu1 %v1268_v56 }
 0x142   : > { %1147 = vmatpush3.bf16.msra.mxu1 %v1268_v56 }
 0x143   : > { %1148 = vmatprep.subr.bf16.mxu1 %v1269_v57 }
 0x146   : > { %1149 = vmatpush3.bf16.msra.mxu1 %v1269_v57 }
 0x1fc   : > { %v1112_v40 = vpop.f32.mrb[0].mxu1 }
 0x1fd   : > { %v437_v42 = vpop.f32.mrb[1].mxu1  ;;  %v446_v44 = vadd.f32 %v1112_v40, %v993_v41 }
 0x1fe   : > { %v1113_v43 = vpop.f32.mrb[2].mxu1  ;;  %v438_v47 = vadd.f32 %v993_v41, %v437_v42 }
 0x1ff   : > { %v449_v45 = vadd.f32 %v1113_v43, %v993_v41  ;;  %v440_v46 = vpop.f32.mrb[3].mxu1 }
 0x200   : > { %v441_v48 = vadd.f32 %v993_v41, %v440_v46 }
 0x201   : > { %v453_v49 = vpack.c.bf16 %v449_v45, %v446_v44 }
 0x202   : > { %v452_v50 = vpack.c.bf16 %v441_v48, %v438_v47 }
 0x204   : > { %1282 = vtanh.bf16 %v452_v50 }
 0x205   : > { %1284 = vtanh.bf16 %v453_v49 }
 0x20f   : > { %v1283_v51 = vpop.eup %1282 }
 0x210   : > { %v1285_v52 = vpop.eup %1284  ;;  %1130 = vmatprep.mubr.bf16.mxu0 %v1283_v51 }
 0x211   : > { %1131 = vmatmul.mubr.bf16.vlgmr.msra.gmra.mrb[4].mxu0 %v1285_v52 }
 0x212   : > { %1155 = vmatpush3.bf16.msra.mxu0 %v1270_v58 }
 0x213   : > { %1156 = vmatprep.subr.bf16.mxu0 %v1271_v59 }
 0x216   : > { %1157 = vmatpush3.bf16.msra.mxu0 %v1271_v59 }
 0x217   : > { %1158 = vmatprep.subr.bf16.mxu0 %v1272_v60 }
 0x21a   : > { %1159 = vmatpush3.bf16.msra.mxu0 %v1272_v60 }
 0x21b   : > { %1160 = vmatprep.subr.bf16.mxu0 %v1273_v10 }
 0x21e   : > { %1161 = vmatpush3.bf16.msra.mxu0 %v1273_v10 }
 0x21f   : > { %1162 = vmatprep.subr.bf16.mxu0 %v1274_v11 }
 0x222   : > { %1163 = vmatpush3.bf16.msra.mxu0 %v1274_v11 }
 0x223   : > { %1164 = vmatprep.subr.bf16.mxu0 %v1275_v12 }
 0x226   : > { %1165 = vmatpush3.bf16.msra.mxu0 %v1275_v12 }
 0x227   : > { %1166 = vmatprep.subr.bf16.mxu0 %v1276_v13 }
 0x22a   : > { %1167 = vmatpush3.bf16.msra.mxu0 %v1276_v13 }
 0x22b   : > { %1168 = vmatprep.subr.bf16.mxu0 %v1277_v14 }
 0x22e   : > { %1169 = vmatpush3.bf16.msra.mxu0 %v1277_v14 }
 0x2e4   : > { %v1132_v61 = vpop.f32.mrb[4].mxu0 }
 0x2e5   : > { %v563_v63 = vpop.f32.mrb[5].mxu0  ;;  %v572_v1 = vadd.f32 %v1132_v61, %v1003_v62 }
 0x2e6   : > { %v1133_v0 = vpop.f32.mrb[6].mxu0  ;;  %v564_v4 = vadd.f32 %v1003_v62, %v563_v63 }
 0x2e7   : > { %v575_v2 = vadd.f32 %v1133_v0, %v1003_v62  ;;  %v566_v3 = vpop.f32.mrb[7].mxu0 }
 0x2e8   : > { %v567_v5 = vadd.f32 %v1003_v62, %v566_v3 }
 0x2e9   : > { %v579_v6 = vpack.c.bf16 %v575_v2, %v572_v1 }
 0x2ea   : > { %v578_v7 = vpack.c.bf16 %v567_v5, %v564_v4 }
 0x2ec   : > { %1286 = vtanh.bf16 %v578_v7 }
 0x2ed   : > { %1288 = vtanh.bf16 %v579_v6 }
 0x2f7   : > { %v1287_v8 = vpop.eup %1286 }
 0x2f8   : > { %v1289_v9 = vpop.eup %1288  ;;  %1150 = vmatprep.mubr.bf16.mxu1 %v1287_v8 }
 0x2f9   : > { %1151 = vmatmul.mubr.bf16.vlgmr.msra.gmra.mrb[4].mxu1 %v1289_v9 }
 0x3cc   : > { %v1152_v15 = vpop.f32.mrb[4].mxu1 }
 0x3cd   : > { %v689_v17 = vpop.f32.mrb[5].mxu1  ;;  %v698_v19 = vadd.f32 %v1152_v15, %v1013_v16 }
 0x3ce   : > { %v1153_v18 = vpop.f32.mrb[6].mxu1  ;;  %v690_v22 = vadd.f32 %v1013_v16, %v689_v17 }
 0x3cf   : > { %v701_v20 = vadd.f32 %v1153_v18, %v1013_v16  ;;  %v692_v21 = vpop.f32.mrb[7].mxu1 }
 0x3d0   : > { %v693_v23 = vadd.f32 %v1013_v16, %v692_v21 }
 0x3d1   : > { %v705_v24 = vpack.c.bf16 %v701_v20, %v698_v19 }
 0x3d2   : > { %v704_v25 = vpack.c.bf16 %v693_v23, %v690_v22 }
 0x3d4   : > { %1290 = vtanh.bf16 %v704_v25 }
 0x3d5   : > { %1292 = vtanh.bf16 %v705_v24 }
 0x3df   : > { %v1291_v26 = vpop.eup %1290 }
 0x3e0   : > { %v1293_v27 = vpop.eup %1292  ;;  %1170 = vmatprep.mubr.bf16.mxu0 %v1291_v26 }
 0x3e1   : > { %1171 = vmatmul.mubr.bf16.vlgmr.msra.gmra.mrb[8].mxu0 %v1293_v27 }
 0x4b4   : > { %v1172_v28 = vpop.f32.mrb[8].mxu0 }
 0x4b5   : > { %v815_v30 = vpop.f32.mrb[9].mxu0  ;;  %v824_v32 = vadd.f32 %v1172_v28, %v1023_v29 }
 0x4b6   : > { %v1173_v31 = vpop.f32.mrb[10].mxu0  ;;  %v816_v35 = vadd.f32 %v1023_v29, %v815_v30 }
 0x4b7   : > { %v827_v33 = vadd.f32 %v1173_v31, %v1023_v29  ;;  %v818_v34 = vpop.f32.mrb[11].mxu0 }
 0x4b8   : > { %v819_v36 = vadd.f32 %v1023_v29, %v818_v34 }
 0x4b9   : > { %v831_v37 = vpack.c.bf16 %v827_v33, %v824_v32 }
 0x4ba   : > { %v830_v38 = vpack.c.bf16 %v819_v36, %v816_v35 }
 0x4bb   : > { %1294 = vtanh.bf16 %v831_v37 }
 0x4bc   : > { %1296 = vtanh.bf16 %v830_v38 }
 0x4c6   : > { %v1295_v39 = vpop.eup %1294 }
 0x4c7   : > { %v1297_v40 = vpop.eup %1296  ;;  %v1034_v41 = vcombine.low %v1295_v39, %v1295_v39  ;;  %v1035_v42 = vcombine.high %v1295_v39, %v1295_v39 }
 0x4c8   : > { %v1032_v43 = vcombine.low %v1297_v40, %v1297_v40  ;;  %v1033_v44 = vcombine.high %v1297_v40, %v1297_v40 }
 0x4c9   : > { %850 = vst [vmem:[%s224_s4 + $0x8] sm:$0xf] %v1034_v41  ;;  %851 = vst [vmem:[%s224_s4 + $0xc] sm:$0xf] %v1035_v42 }
 0x4ca   : > { %848 = vst [vmem:[%s224_s4] sm:$0xf] %v1032_v43  ;;  %849 = vst [vmem:[%s224_s4 + $0x4] sm:$0xf] %v1033_v44 }
 0x4cb   : > { %1339 = shalt.err (!%p1336_p6)
}
 0x4cc   : > { %s1340_s9 = scalar_lea.hbm %s1553_s26, 256  ;;  %s1344_s18 = scalar_lea.hbm %s1606_s3, 512 }
 0x4cd   : > { %p1341_p7 = scmp.ne.s32.totalorder %s1553_s26, %s1340_s9  ;;  %p1345_p0 = scmp.lt.u32.totalorder %s1553_s26, %s1606_s3 }
 0x4ce   : > { %p1346_p2 = scmp.lt.u32.totalorder %s1344_s18, %s1340_s9  ;;  %p1348_p8 = scmp.lt.u32.totalorder %s1340_s9, %s1553_s26 }
 0x4cf   : > { %p1342_p9 = pnand %p1341_p7, %p1618_p10 }
 0x4d0   : > { %p1347_p4 = por %p1346_p2, %p1345_p0 }
 0x4d1   : > { %p1343_p12 = pneg %p1342_p9 }
 0x4d2   : > { %p1349_p11 = por %p1348_p8, %p1347_p4 }
 0x4d4   : > { %p1350_p13 = pnand %p1349_p11, %p1343_p12 }
 0x4d6   : > { %1353 = shalt.err (!%p1350_p13)
}
 0x4d7   : > { %s1414_s23 = smov 64   ;;  %s1415_s28 = smov 4  }
 0x4d8   : > { %1178 = dma.vmem_to_hbm [thread:$0]  (%p1618_p10), %s1555_s5, 256, %s1553_s26, %s1557_s15, %s1414_s23, %s1414_s23, %s1415_s28  }
 0x4d9 PF: > { %p1190_p1 = scmp.ge.s32.totalorder %s1408_s17, 2  ;;  %s883_s4 = sand.u32 1, %s1388_s12  }
 0x4da   : > { %p1619_p3 = scmp.ne.s32.totalorder %s1612_s24, 0  ;;  %s884_s30 = scalar_lea.sflag [#allocation4], %s883_s4 }
 0x4dc   : > { %p1185_p5 = pnand %p1190_p1, %p1619_p3 }
 0x4de   : > { %1383 = dma.done.wait (!%p1185_p5), %s884_s30, 256  }
 0x4df   : > { %1385 = vsyncadd (!%p1185_p5), %s884_s30, 4294967040  ;;  %s17_s17 = sadd.s32 1, %s1408_s17   ;;  %s1620_s12 = smov %s1392_s13 }
 0x4e0   : > { %p14_p6 = scmp.ge.s32.totalorder %s17_s17, 4   ;;  %s1621_s13 = smov %s1396_s14 }
 0x4e1   : > { %s1622_s14 = smov %s1489_s25  ;;  %s1623_s15 = smov %s1404_s16 }
 0x4e2   : > { %s1624_s16 = smov %s1626_s20  ;;  %16 = sbr.rel (!%p14_p6) target bundleno = 5 (0x5), region = 84 }
 0x4e9   :  { %889 = vsyncpa [#allocation3], 1 }
 0x4ea   :  { %891 = vsyncpa [#allocation3 + $0x1], 1 }
 0x4eb   :  { %892 = vsyncpa [#allocation4], 1 }
 0x4ec   :  { %894 = vsyncpa [#allocation4 + $0x1], 1 }

</bundles_post_ra>
